<compile_context>
chip_gen: v7x
topology: tpu7x:2x2x1
jax: 0.10.0
libtpu: 0.0.40
codegen_flags: <defaults>
</compile_context>

<pallas_src>
import jax
import jax.numpy as jnp
from jax.experimental import pallas as pl
from jax.experimental.pallas import tpu as pltpu


def controller_kernel(x_ref, w1t_ref, b1_ref, w2t_ref, b2_ref, o_ref):
    # Layer 1: x[B, D_in] @ w1t[D_in, H1]  (canonical MXU contraction).
    h = jnp.dot(x_ref[...], w1t_ref[...], preferred_element_type=jnp.float32)
    h = jnp.maximum(h + b1_ref[...], 0.0)          # bias + ReLU on the VPU
    # Layer 2: h[B, H1] @ w2t[H1, O]
    u = jnp.dot(h, w2t_ref[...], preferred_element_type=jnp.float32)
    o_ref[...] = (u + b2_ref[...]).astype(o_ref.dtype)


def _pick_batch_tile(B, *, target_steps=8, min_tile=256, max_tile=8192):
    """Aim for ~2-8 grid steps; keep tiles sublane-aligned and VMEM-safe."""
    tb = max(pl.cdiv(B, target_steps), min_tile)
    tb = min(tb, max_tile)
    return ((tb + 7) // 8) * 8


def controller_net(x, w1, b1, w2, b2, *, small_batch_threshold=512):
    """x: [B, D_in]; w1: [H1, D_in]; b1: [H1]; w2: [O, H1]; b2: [O]."""
    B, D_in = x.shape
    H1 = w1.shape[0]
    O = w2.shape[0]

    # One-time, tiny (~4 KiB) transposes + metadata reshapes in the wrapper.
    w1t = w1.T                      # [D_in, H1]
    w2t = w2.T                      # [H1, O]
    b1_2d = b1.reshape(1, H1)
    b2_2d = b2.reshape(1, O)
    out_shape = jax.ShapeDtypeStruct((B, O), x.dtype)

    itemsize = jnp.dtype(x.dtype).itemsize
    cost = pl.CostEstimate(
        flops=2 * B * (D_in * H1 + H1 * O),
        transcendentals=0,
        bytes_accessed=(x.size + w1.size + b1.size + w2.size + b2.size
                        + B * O) * itemsize,
    )

    if B <= small_batch_threshold:
        # Small batch: single shot, no grid, no pipeline scaffolding.
        return pl.pallas_call(
            controller_kernel,
            out_shape=out_shape,
            cost_estimate=cost,
        )(x, w1t, b1_2d, w2t, b2_2d)

    # Large batch: tile only the batch dimension; weights/biases use constant
    # index maps so they stay VMEM-resident across grid steps.  Grid length is
    # always >= 2 here, so the "parallel" axis shards across v7x's two TCs.
    tb = _pick_batch_tile(B)
    grid = (pl.cdiv(B, tb),)        # ragged last block handled by Pallas

    # VMEM budget: x and out blocks lane-pad to 128 and are double-buffered,
    # plus one h-sized intermediate tile; clamp to [32 MiB, 48 MiB] so it is
    # safe on v7x (64 MiB physical) and above v5e's 16 MiB default scope.
    vmem_needed = tb * 128 * 4 * 5 + (2 << 20)
    vmem_limit = int(min(max(vmem_needed, 32 << 20), 48 << 20))

    return pl.pallas_call(
        controller_kernel,
        out_shape=out_shape,
        grid=grid,
        in_specs=[
            pl.BlockSpec((tb, D_in), lambda i: (i, 0)),
            pl.BlockSpec((D_in, H1), lambda i: (0, 0)),
            pl.BlockSpec((1, H1), lambda i: (0, 0)),
            pl.BlockSpec((H1, O), lambda i: (0, 0)),
            pl.BlockSpec((1, O), lambda i: (0, 0)),
        ],
        out_specs=pl.BlockSpec((tb, O), lambda i: (i, 0)),
        compiler_params=pltpu.CompilerParams(
            dimension_semantics=("parallel",),
            vmem_limit_bytes=vmem_limit,
        ),
        cost_estimate=cost,
    )(x, w1t, b1_2d, w2t, b2_2d)


if __name__ == "__main__":
    # Shapes implied by the module: D_in=32, H1=32, out=2.
    D_in, H1, O = 32, 32, 2

    key = jax.random.PRNGKey(0)
    kx, kw1, kb1, kw2, kb2, kxl, kxr = jax.random.split(key, 7)

    # Parameters in PyTorch nn.Linear layout (weight = [out_features, in_features]).
    w1 = jax.random.normal(kw1, (H1, D_in), dtype=jnp.float32) * 0.1
    b1 = jax.random.normal(kb1, (H1,), dtype=jnp.float32) * 0.1
    w2 = jax.random.normal(kw2, (O, H1), dtype=jnp.float32) * 0.1
    b2 = jax.random.normal(kb2, (O,), dtype=jnp.float32) * 0.1

    def ref_forward(xx):
        h_ref = jnp.maximum(xx @ w1.T + b1, 0.0)
        return h_ref @ w2.T + b2

    # --- small-batch path (no grid, latency-optimized) ---
    B_small = 8
    x_small = jax.random.normal(kx, (B_small, D_in), dtype=jnp.float32)
    u_small = jax.block_until_ready(controller_net(x_small, w1, b1, w2, b2))
    assert u_small.shape == (B_small, O)
    assert jnp.allclose(u_small, ref_forward(x_small), atol=1e-5, rtol=1e-5)

    # --- batched path (batch grid, weights VMEM-resident, parallel axis) ---
    B_large = 1024
    x_large = jax.random.normal(kxl, (B_large, D_in), dtype=jnp.float32)
    u_large = jax.block_until_ready(controller_net(x_large, w1, b1, w2, b2))
    assert u_large.shape == (B_large, O)
    assert jnp.allclose(u_large, ref_forward(x_large), atol=1e-5, rtol=1e-5)

    # --- ragged batched path (B not a multiple of the tile) ---
    B_ragged = 1000
    x_ragged = jax.random.normal(kxr, (B_ragged, D_in), dtype=jnp.float32)
    u_ragged = jax.block_until_ready(controller_net(x_ragged, w1, b1, w2, b2))
    assert u_ragged.shape == (B_ragged, O)
    assert jnp.allclose(u_ragged, ref_forward(x_ragged), atol=1e-5, rtol=1e-5)

    print("KERNEL_OK")
</pallas_src>

<mosaic_0001>
module attributes {stable_mosaic.version = 11 : i64} {
  func.func @controller_kernel(%arg0: memref<8x32xf32, #tpu.memory_space<vmem>>, %arg1: memref<32x32xf32, #tpu.memory_space<vmem>>, %arg2: memref<1x32xf32, #tpu.memory_space<vmem>>, %arg3: memref<32x2xf32, #tpu.memory_space<vmem>>, %arg4: memref<1x2xf32, #tpu.memory_space<vmem>>, %arg5: memref<8x2xf32, #tpu.memory_space<vmem>>) attributes {dimension_semantics = [], scalar_prefetch = 0 : i64, scratch_operands = 0 : i64, tpu.core_type = #tpu.core_type<tc>} {
    %c0 = arith.constant 0 : index
    %c0_0 = arith.constant 0 : index
    %0 = vector.load %arg0[%c0, %c0_0] : memref<8x32xf32, #tpu.memory_space<vmem>>, vector<8x32xf32>
    %c0_1 = arith.constant 0 : index
    %c0_2 = arith.constant 0 : index
    %1 = vector.load %arg1[%c0_1, %c0_2] : memref<32x32xf32, #tpu.memory_space<vmem>>, vector<32x32xf32>
    %cst = arith.constant dense<0.000000e+00> : vector<8x32xf32>
    %2 = tpu.matmul %0, %1, %cst {dimension_numbers = #tpu.dot_dimension_numbers<[1], [0], [0], [1], [0, 0, 1, 1], [], []>} : vector<8x32xf32>, vector<32x32xf32>, vector<8x32xf32> -> vector<8x32xf32>
    %c0_3 = arith.constant 0 : index
    %c0_4 = arith.constant 0 : index
    %3 = vector.load %arg2[%c0_3, %c0_4] : memref<1x32xf32, #tpu.memory_space<vmem>>, vector<1x32xf32>
    %4 = vector.broadcast %3 : vector<1x32xf32> to vector<8x32xf32>
    %5 = arith.addf %2, %4 : vector<8x32xf32>
    %cst_5 = arith.constant 0.000000e+00 : f32
    %6 = vector.broadcast %cst_5 : f32 to vector<8x32xf32>
    %7 = arith.maximumf %5, %6 : vector<8x32xf32>
    %c0_6 = arith.constant 0 : index
    %c0_7 = arith.constant 0 : index
    %8 = vector.load %arg3[%c0_6, %c0_7] : memref<32x2xf32, #tpu.memory_space<vmem>>, vector<32x2xf32>
    %cst_8 = arith.constant dense<0.000000e+00> : vector<8x2xf32>
    %9 = tpu.matmul %7, %8, %cst_8 {dimension_numbers = #tpu.dot_dimension_numbers<[1], [0], [0], [1], [0, 0, 1, 1], [], []>} : vector<8x32xf32>, vector<32x2xf32>, vector<8x2xf32> -> vector<8x2xf32>
    %c0_9 = arith.constant 0 : index
    %c0_10 = arith.constant 0 : index
    %10 = vector.load %arg4[%c0_9, %c0_10] : memref<1x2xf32, #tpu.memory_space<vmem>>, vector<1x2xf32>
    %11 = vector.broadcast %10 : vector<1x2xf32> to vector<8x2xf32>
    %12 = arith.addf %9, %11 : vector<8x2xf32>
    %c0_11 = arith.constant 0 : index
    %c0_12 = arith.constant 0 : index
    %13 = vector.load %arg5[%c0_11, %c0_12] : memref<8x2xf32, #tpu.memory_space<vmem>>, vector<8x2xf32>
    tpu.vector_store %arg5[%c0_11, %c0_12], %12 {strides = array<i32>} : memref<8x2xf32, #tpu.memory_space<vmem>>, vector<8x2xf32>,
    return
  }
}

</mosaic_0001>

<bundles_post_ra>
// kernel: tpu_custom_call.1
= control target key start
LH: loop header
LB: loop body
LE: loop exit
PB: predicated region body
PF: predicated region fallthrough
CT: control target
= control target key end

     0   :  { %10 = vsyncpa [#allocation3], 0  ;;  %s286_s18 = smov [#allocation2]   ;;  %s365_s0 = inlined_call_operand.hbm [shape: f32[8,32], index: 0, kind: input, shape index: {}]   ;;  %s366_s1 = inlined_call_operand.vmem [shape: f32[32,32], index: 1, kind: input, shape index: {}]   ;;  %s367_s2 = inlined_call_operand.vmem [shape: f32[1,32], index: 2, kind: input, shape index: {}]   ;;  %s368_s3 = inlined_call_operand.vmem [shape: f32[32,2], index: 3, kind: input, shape index: {}]   ;;  %s369_s4 = inlined_call_operand.vmem [shape: f32[1,2], index: 4, kind: input, shape index: {}]   ;;  %s370_s5 = inlined_call_operand.vmem [shape: f32[8,2], index: 5, kind: output, shape index: {}]  }
   0x1   :  { %s17_s19 = sshll.u32 %s286_s18, 4  ;;  %s262_s22 = scalar_lea.hbm %s365_s0, 128  ;;  %s18_s19 = int_to_ptr.vmem [resolvable:$true] %s17_s19 }
   0x2   :  { %p263_p0 = scmp.ne.s32.totalorder %s365_s0, %s262_s22  ;;  %p266_p1 = scmp.lt.u32.totalorder %s262_s22, %s365_s0 }
   0x4   :  { %p268_p2 = pnand %p266_p1, %p263_p0 }
   0x6   :  { %271 = shalt.err (!%p268_p2)
}
   0x7   :  { %s272_s27 = scalar_lea.vmem %s18_s19, 128  ;;  %p277_p4 = scmp.lt.s32.totalorder %s18_s19, %s18_s19 }
   0x8   :  { %p273_p3 = scmp.ne.s32.totalorder %s18_s19, %s272_s27  ;;  %p278_p5 = scmp.lt.s32.totalorder %s272_s27, %s272_s27 }
   0xa   :  { %p279_p6 = por %p278_p5, %p277_p4 }
   0xc   :  { %p280_p7 = pnand %p279_p6, %p273_p3 }
   0xe   :  { %283 = shalt.err (!%p280_p7)
}
   0xf   :  { %20 = dma.hbm_to_vmem [thread:$0]  %s365_s0, 128, %s18_s19, [#allocation3]  }
  0x10   :  { %284 = dma.done.wait [#allocation3], 128  }
  0x11   :  { %285 = vsyncadd [#allocation3], 4294967168  ;;  %v287_v0 = vmov 0.0|0.0   ;;  %vm288_vm0 = vmmov 0   ;;  %v289_v1 = vmov 0.0   ;;  %v33_v2 = vld [vmem:[%s366_s1] sm:$0xff] }
  0x12   :  { %246 = vmatprep.subr.bf16.mxu0 %v287_v0  ;;  %232 = vmatprep.mubr.msk.f32.mxu0 %vm288_vm0, %v289_v1  ;;  %v34_v3 = vld [vmem:[%s366_s1 + $0x8] sm:$0xff]  ;;  %v35_v4 = vld [vmem:[%s366_s1 + $0x10] sm:$0xff]  ;;  %v36_v6 = vld [vmem:[%s366_s1 + $0x18] sm:$0xff]  ;;  %vm44_vm1 = vcmask 261120   ;;  %vm203_vm2 = vcmask 15360  }
  0x13   :  { %252 = vmatprep.subr.bf16.mxu1 %v287_v0  ;;  %243 = vmatprep.mubr.msk.f32.mxu1 %vm288_vm0, %v289_v1  ;;  %v247_v5 = vpack.c.bf16 %v34_v3, %v33_v2  ;;  %v119_v7 = vld [vmem:[%s368_s3] sm:$0xff]  ;;  %v120_v8 = vld [vmem:[%s368_s3 + $0x8] sm:$0xff]  ;;  %v250_v9 = vpack.c.bf16 %v36_v6, %v35_v4  ;;  %v121_v12 = vld [vmem:[%s368_s3 + $0x10] sm:$0xff] }
  0x14   :  { %v253_v10 = vpack.c.bf16 %v120_v8, %v119_v7  ;;  %v32_v11 = vld [vmem:[#allocation2] sm:$0xff]  ;;  %v122_v13 = vld [vmem:[%s368_s3 + $0x18] sm:$0xff] }
  0x15   :  { %248 = vmatpush3.bf16.msra.mxu0 %v247_v5  ;;  %v256_v14 = vpack.c.bf16 %v122_v13, %v121_v12  ;;  %v210_v15 = vld [vmem:[%s367_s2] ss:$0 sm:$0xff] }
  0x16   :  { %249 = vmatprep.subr.bf16.mxu0 %v287_v0  ;;  %254 = vmatpush3.bf16.msra.mxu1 %v253_v10  ;;  %v212_v20 = vld [vmem:[%s369_s4] ss:$0 sm:$0xff] }
  0x17   :  { %255 = vmatprep.subr.bf16.mxu1 %v287_v0 }
  0x19   :  { %251 = vmatpush3.bf16.msra.mxu0 %v250_v9 }
  0x1a   :  { %257 = vmatpush3.bf16.msra.mxu1 %v256_v14 }
  0x1c   :  { %233 = vmatmul.mubr.msk.f32.vlgmr.msra.gmra.mrb[0].mxu0 %vm44_vm1, %v32_v11 }
  0xef   :  { %v114_v16 = vpop.f32.mrb[0].mxu0 }
  0xf0   :  { %v115_v17 = vadd.f32 %v210_v15, %v114_v16  ;;  %v234_v18 = vpop.f32.mrb[1].mxu0 }
  0xf2   :  { %v118_v19 = vmax.f32 %v115_v17, 0.0 }
  0xf4   :  { %244 = vmatmul.mubr.msk.f32.vlgmr.msra.gmra.mrb[0].mxu1 %vm44_vm1, %v118_v19 }
 0x1c7   :  { %v199_v21 = vpop.f32.mrb[0].mxu1 }
 0x1c8   :  { %v200_v22 = vadd.f32 %v212_v20, %v199_v21  ;;  %v245_v23 = vpop.f32.mrb[1].mxu1 }
 0x1ca   :  { %204 = vst.msk [vmem:[%s370_s5] sm:$0xff] %vm203_vm2, %v200_v22 }
 0x1cb   :  { %209 = vsyncpa [#allocation3], 1 }

</bundles_post_ra>
